<compile_context>
chip_gen: v6e
topology: v6e:2x2x1
jax: 0.10.0
libtpu: 0.0.40
codegen_flags: <defaults>
</compile_context>

<pallas_src>
import math

import jax
import jax.numpy as jnp
from jax.experimental import pallas as pl
from jax.experimental.pallas import tpu as pltpu

_LANE = 128
_SUBLANE = 8


def _round_up(x, m):
    return ((x + m - 1) // m) * m


def _make_mlp_kernel(num_layers):
    """Kernel over one batch tile: chain of (dot + bias [+ ReLU]) layers."""

    def kernel(*refs):
        x_ref = refs[0]
        o_ref = refs[-1]
        wb_refs = refs[1:-1]  # interleaved (W0, b0, W1, b1, ...)

        h = x_ref[...]
        for li in range(num_layers):
            w_ref = wb_refs[2 * li]
            b_ref = wb_refs[2 * li + 1]
            # MXU matmul (bf16 operands if weights were pre-cast), f32 accumulate.
            h = jnp.dot(h.astype(w_ref.dtype), w_ref[...],
                        preferred_element_type=jnp.float32)
            h = h + b_ref[...]           # bias add stays in f32 (v5e-safe epilogue)
            if li < num_layers - 1:
                h = jnp.maximum(h, 0.0)  # ReLU on hidden layers only
        o_ref[...] = h.astype(o_ref.dtype)

    return kernel


def _pick_tm(batch, tm_req):
    """Pick the batch tile: big (amortize grid-step cost) but >= 2 grid steps
    when batch is large enough so the 'parallel' axis can shard across the two
    v7x TensorCores."""
    tm = min(max(tm_req, _SUBLANE), _round_up(batch, _SUBLANE))
    if batch >= 2 * _LANE:
        tm = min(tm, _round_up(pl.cdiv(batch, 2), _LANE))
    if tm >= _LANE:
        tm = (tm // _LANE) * _LANE        # lane-multiple tiles for big batches
    else:
        tm = max(_SUBLANE, (tm // _SUBLANE) * _SUBLANE)
    return tm


def dense_layers_forward(x, params, *, tm=1024, mxu_dtype=None, pad_output=False):
    """Fused MLP forward.

    params = [(W0, b0), ..., (WL, bL)] with W_i: [in, out], b_i: [1, out].
    mxu_dtype: optional dtype (e.g. jnp.bfloat16) for MXU weight operands
      (v6e/v7x fast path). Pass x already in that dtype to halve input traffic.
    pad_output: if True, lane-pad the final output to 128 and slice afterwards
      (lane-dense stores); default False writes only the real out_dim columns.
    """
    batch, in_dim = x.shape
    num_layers = len(params)
    out_dim = params[-1][0].shape[1]

    # ---- Pad hidden widths (and optionally output width) to 128 lanes. ------
    padded = []
    prev_k = in_dim  # x itself is never padded (no extra HBM pass)
    for li, (w, b) in enumerate(params):
        k, n = w.shape
        is_last = li == num_layers - 1
        n_pad = n if (is_last and not pad_output) else _round_up(n, _LANE)
        w_p = jnp.zeros((prev_k, n_pad), w.dtype).at[:k, :n].set(w)
        b_p = jnp.zeros((1, n_pad), b.dtype).at[:, :n].set(b)
        if mxu_dtype is not None:
            w_p = w_p.astype(mxu_dtype)   # cast once in wrapper, not per tile
        padded.append((w_p, b_p))
        prev_k = n_pad
    out_last = prev_k  # == out_dim when pad_output=False

    # ---- Batch tiling. -------------------------------------------------------
    tm = _pick_tm(batch, tm)
    grid = (pl.cdiv(batch, tm),)

    flat = [a for wb in padded for a in wb]
    in_specs = [pl.BlockSpec((tm, in_dim), lambda i: (i, 0))]
    for w_p, b_p in padded:
        # Constant index_map -> weight/bias tile stays resident in VMEM.
        in_specs.append(pl.BlockSpec(w_p.shape, lambda i: (0, 0)))
        in_specs.append(pl.BlockSpec(b_p.shape, lambda i: (0, 0)))
    out_spec = pl.BlockSpec((tm, out_last), lambda i: (i, 0))

    # Advisory cost estimate for XLA's scheduler around the custom call.
    flops = 2 * batch * sum(w.shape[0] * w.shape[1] for w, _ in padded)
    bytes_accessed = (
        x.size * x.dtype.itemsize
        + sum(a.size * a.dtype.itemsize for a in flat)
        + batch * out_last * jnp.dtype(x.dtype).itemsize
    )
    cost = pl.CostEstimate(flops=flops, transcendentals=0,
                           bytes_accessed=bytes_accessed)

    # Explicit VMEM limit only when double-buffered tiles + resident weights
    # would exceed the smallest default scoped limit (v5e: 16 MiB).
    itemsize = jnp.dtype(x.dtype).itemsize
    needed = (2 * tm * (in_dim + out_last) * itemsize            # x / y double-buffers
              + 2 * sum(a.size * a.dtype.itemsize for a in flat)  # weights (pessimistic 2x)
              + (4 << 20))                                        # headroom
    compiler_kwargs = dict(dimension_semantics=("parallel",))
    if needed > (16 << 20):
        compiler_kwargs["vmem_limit_bytes"] = min(needed, 100 << 20)

    y = pl.pallas_call(
        _make_mlp_kernel(num_layers),
        out_shape=jax.ShapeDtypeStruct((batch, out_last), x.dtype),
        grid=grid,
        in_specs=in_specs,
        out_specs=out_spec,
        compiler_params=pltpu.CompilerParams(**compiler_kwargs),
        cost_estimate=cost,
    )(x, *flat)

    if pad_output and out_last != out_dim:
        y = y[:, :out_dim]
    return y


def init_dense_layers_params(key, input_dim, output_dim, latent_dim=(50, 50, 50),
                             dtype=jnp.float32):
    """Mimics torch.nn.Linear default init U(-1/sqrt(fan_in), 1/sqrt(fan_in))."""
    dims = [input_dim] + list(latent_dim) + [output_dim]
    params = []
    for i in range(len(dims) - 1):
        fan_in, fan_out = dims[i], dims[i + 1]
        key, kw, kb = jax.random.split(key, 3)
        bound = 1.0 / math.sqrt(fan_in)
        w = jax.random.uniform(kw, (fan_in, fan_out), dtype, -bound, bound)
        b = jax.random.uniform(kb, (1, fan_out), dtype, -bound, bound)
        params.append((w, b))
    return params


def _reference_forward(x, params):
    h = x
    for i, (w, b) in enumerate(params):
        h = h @ w + b
        if i < len(params) - 1:
            h = jnp.maximum(h, 0.0)
    return h


if __name__ == "__main__":
    key = jax.random.PRNGKey(0)
    kx, kx2, kp = jax.random.split(key, 3)

    batch, input_dim, output_dim = 8, 32, 16
    latent_dim = (50, 50, 50)

    x = jax.random.normal(kx, (batch, input_dim), dtype=jnp.float32)
    params = init_dense_layers_params(kp, input_dim, output_dim, latent_dim)
    y_ref = _reference_forward(x, params)

    # 1) f32 path, unpadded output writeback (default).
    y = jax.block_until_ready(dense_layers_forward(x, params))
    assert y.shape == (batch, output_dim)
    assert jnp.allclose(y, y_ref, atol=1e-5, rtol=1e-5)

    # 2) f32 path with lane-padded output store (A/B alternative).
    y_p = jax.block_until_ready(dense_layers_forward(x, params, pad_output=True))
    assert y_p.shape == (batch, output_dim)
    assert jnp.allclose(y_p, y_ref, atol=1e-5, rtol=1e-5)

    # 3) bf16-on-MXU fast path (v6e/v7x): bf16 activations in, bf16 out,
    #    f32 accumulation inside the kernel.
    x_bf16 = x.astype(jnp.bfloat16)
    y_bf16 = jax.block_until_ready(
        dense_layers_forward(x_bf16, params, mxu_dtype=jnp.bfloat16))
    assert y_bf16.shape == (batch, output_dim)
    assert y_bf16.dtype == jnp.bfloat16
    assert jnp.allclose(y_bf16.astype(jnp.float32), y_ref, atol=1e-1, rtol=1e-1)

    # 4) Multi-step grid + partial final tile (exercises tm selection / masking).
    batch2 = 300
    x2 = jax.random.normal(kx2, (batch2, input_dim), dtype=jnp.float32)
    y2_ref = _reference_forward(x2, params)
    y2 = jax.block_until_ready(dense_layers_forward(x2, params))
    assert y2.shape == (batch2, output_dim)
    assert jnp.allclose(y2, y2_ref, atol=1e-5, rtol=1e-5)

    print("KERNEL_OK")
</pallas_src>

<mosaic_0001>
module attributes {stable_mosaic.version = 11 : i64} {
  func.func @kernel(%arg0: i32, %arg1: memref<8x32xf32, #tpu.memory_space<vmem>>, %arg2: memref<32x128xf32, #tpu.memory_space<vmem>>, %arg3: memref<1x128xf32, #tpu.memory_space<vmem>>, %arg4: memref<128x128xf32, #tpu.memory_space<vmem>>, %arg5: memref<1x128xf32, #tpu.memory_space<vmem>>, %arg6: memref<128x128xf32, #tpu.memory_space<vmem>>, %arg7: memref<1x128xf32, #tpu.memory_space<vmem>>, %arg8: memref<128x16xf32, #tpu.memory_space<vmem>>, %arg9: memref<1x16xf32, #tpu.memory_space<vmem>>, %arg10: memref<8x16xf32, #tpu.memory_space<vmem>>) attributes {dimension_semantics = [#tpu.dimension_semantics<parallel>], iteration_bounds = array<i64: 1>, scalar_prefetch = 0 : i64, scratch_operands = 0 : i64, tpu.core_type = #tpu.core_type<tc>, window_params = [{transform_indices = @transform_0, window_bounds = array<i64: 8, 32>}, {pipeline_mode = #tpu.pipeline_mode<synchronous>, transform_indices = @transform_1, window_bounds = array<i64: 32, 128>}, {pipeline_mode = #tpu.pipeline_mode<synchronous>, transform_indices = @transform_2, window_bounds = array<i64: 1, 128>}, {pipeline_mode = #tpu.pipeline_mode<synchronous>, transform_indices = @transform_3, window_bounds = array<i64: 128, 128>}, {pipeline_mode = #tpu.pipeline_mode<synchronous>, transform_indices = @transform_4, window_bounds = array<i64: 1, 128>}, {pipeline_mode = #tpu.pipeline_mode<synchronous>, transform_indices = @transform_5, window_bounds = array<i64: 128, 128>}, {pipeline_mode = #tpu.pipeline_mode<synchronous>, transform_indices = @transform_6, window_bounds = array<i64: 1, 128>}, {pipeline_mode = #tpu.pipeline_mode<synchronous>, transform_indices = @transform_7, window_bounds = array<i64: 128, 16>}, {pipeline_mode = #tpu.pipeline_mode<synchronous>, transform_indices = @transform_8, window_bounds = array<i64: 1, 16>}, {transform_indices = @transform_9, window_bounds = array<i64: 8, 16>}]} {
    %c0 = arith.constant 0 : index
    %c0_0 = arith.constant 0 : index
    %0 = vector.load %arg1[%c0, %c0_0] : memref<8x32xf32, #tpu.memory_space<vmem>>, vector<8x32xf32>
    %c0_1 = arith.constant 0 : index
    %c0_2 = arith.constant 0 : index
    %1 = vector.load %arg2[%c0_1, %c0_2] : memref<32x128xf32, #tpu.memory_space<vmem>>, vector<32x128xf32>
    %cst = arith.constant dense<0.000000e+00> : vector<8x128xf32>
    %2 = tpu.matmul %0, %1, %cst {dimension_numbers = #tpu.dot_dimension_numbers<[1], [0], [0], [1], [0, 0, 1, 1], [], []>} : vector<8x32xf32>, vector<32x128xf32>, vector<8x128xf32> -> vector<8x128xf32>
    %c0_3 = arith.constant 0 : index
    %c0_4 = arith.constant 0 : index
    %3 = vector.load %arg3[%c0_3, %c0_4] : memref<1x128xf32, #tpu.memory_space<vmem>>, vector<1x128xf32>
    %4 = vector.broadcast %3 : vector<1x128xf32> to vector<8x128xf32>
    %5 = arith.addf %2, %4 : vector<8x128xf32>
    %cst_5 = arith.constant 0.000000e+00 : f32
    %6 = vector.broadcast %cst_5 : f32 to vector<8x128xf32>
    %7 = arith.maximumf %5, %6 : vector<8x128xf32>
    %c0_6 = arith.constant 0 : index
    %c0_7 = arith.constant 0 : index
    %8 = vector.load %arg4[%c0_6, %c0_7] : memref<128x128xf32, #tpu.memory_space<vmem>>, vector<128x128xf32>
    %cst_8 = arith.constant dense<0.000000e+00> : vector<8x128xf32>
    %9 = tpu.matmul %7, %8, %cst_8 {dimension_numbers = #tpu.dot_dimension_numbers<[1], [0], [0], [1], [0, 0, 1, 1], [], []>} : vector<8x128xf32>, vector<128x128xf32>, vector<8x128xf32> -> vector<8x128xf32>
    %c0_9 = arith.constant 0 : index
    %c0_10 = arith.constant 0 : index
    %10 = vector.load %arg5[%c0_9, %c0_10] : memref<1x128xf32, #tpu.memory_space<vmem>>, vector<1x128xf32>
    %11 = vector.broadcast %10 : vector<1x128xf32> to vector<8x128xf32>
    %12 = arith.addf %9, %11 : vector<8x128xf32>
    %cst_11 = arith.constant 0.000000e+00 : f32
    %13 = vector.broadcast %cst_11 : f32 to vector<8x128xf32>
    %14 = arith.maximumf %12, %13 : vector<8x128xf32>
    %c0_12 = arith.constant 0 : index
    %c0_13 = arith.constant 0 : index
    %15 = vector.load %arg6[%c0_12, %c0_13] : memref<128x128xf32, #tpu.memory_space<vmem>>, vector<128x128xf32>
    %cst_14 = arith.constant dense<0.000000e+00> : vector<8x128xf32>
    %16 = tpu.matmul %14, %15, %cst_14 {dimension_numbers = #tpu.dot_dimension_numbers<[1], [0], [0], [1], [0, 0, 1, 1], [], []>} : vector<8x128xf32>, vector<128x128xf32>, vector<8x128xf32> -> vector<8x128xf32>
    %c0_15 = arith.constant 0 : index
    %c0_16 = arith.constant 0 : index
    %17 = vector.load %arg7[%c0_15, %c0_16] : memref<1x128xf32, #tpu.memory_space<vmem>>, vector<1x128xf32>
    %18 = vector.broadcast %17 : vector<1x128xf32> to vector<8x128xf32>
    %19 = arith.addf %16, %18 : vector<8x128xf32>
    %cst_17 = arith.constant 0.000000e+00 : f32
    %20 = vector.broadcast %cst_17 : f32 to vector<8x128xf32>
    %21 = arith.maximumf %19, %20 : vector<8x128xf32>
    %c0_18 = arith.constant 0 : index
    %c0_19 = arith.constant 0 : index
    %22 = vector.load %arg8[%c0_18, %c0_19] : memref<128x16xf32, #tpu.memory_space<vmem>>, vector<128x16xf32>
    %cst_20 = arith.constant dense<0.000000e+00> : vector<8x16xf32>
    %23 = tpu.matmul %21, %22, %cst_20 {dimension_numbers = #tpu.dot_dimension_numbers<[1], [0], [0], [1], [0, 0, 1, 1], [], []>} : vector<8x128xf32>, vector<128x16xf32>, vector<8x16xf32> -> vector<8x16xf32>
    %c0_21 = arith.constant 0 : index
    %c0_22 = arith.constant 0 : index
    %24 = vector.load %arg9[%c0_21, %c0_22] : memref<1x16xf32, #tpu.memory_space<vmem>>, vector<1x16xf32>
    %25 = vector.broadcast %24 : vector<1x16xf32> to vector<8x16xf32>
    %26 = arith.addf %23, %25 : vector<8x16xf32>
    %c0_23 = arith.constant 0 : index
    %c0_24 = arith.constant 0 : index
    %27 = vector.load %arg10[%c0_23, %c0_24] : memref<8x16xf32, #tpu.memory_space<vmem>>, vector<8x16xf32>
    tpu.vector_store %arg10[%c0_23, %c0_24], %26 {strides = array<i32>} : memref<8x16xf32, #tpu.memory_space<vmem>>, vector<8x16xf32>,
    return
  }
  func.func @transform_0(%arg0: i32) -> (i32, i32) {
    %c0_i32 = arith.constant 0 : i32
    %c0_i32_0 = arith.constant 0 : i32
    return %arg0, %c0_i32 : i32, i32
  }
  func.func @transform_1(%arg0: i32) -> (i32, i32) {
    %c0_i32 = arith.constant 0 : i32
    %c0_i32_0 = arith.constant 0 : i32
    %c0_i32_1 = arith.constant 0 : i32
    return %c0_i32, %c0_i32_0 : i32, i32
  }
  func.func @transform_2(%arg0: i32) -> (i32, i32) {
    %c0_i32 = arith.constant 0 : i32
    %c0_i32_0 = arith.constant 0 : i32
    %c0_i32_1 = arith.constant 0 : i32
    return %c0_i32, %c0_i32_0 : i32, i32
  }
  func.func @transform_3(%arg0: i32) -> (i32, i32) {
    %c0_i32 = arith.constant 0 : i32
    %c0_i32_0 = arith.constant 0 : i32
    %c0_i32_1 = arith.constant 0 : i32
    return %c0_i32, %c0_i32_0 : i32, i32
  }
  func.func @transform_4(%arg0: i32) -> (i32, i32) {
    %c0_i32 = arith.constant 0 : i32
    %c0_i32_0 = arith.constant 0 : i32
    %c0_i32_1 = arith.constant 0 : i32
    return %c0_i32, %c0_i32_0 : i32, i32
  }
  func.func @transform_5(%arg0: i32) -> (i32, i32) {
    %c0_i32 = arith.constant 0 : i32
    %c0_i32_0 = arith.constant 0 : i32
    %c0_i32_1 = arith.constant 0 : i32
    return %c0_i32, %c0_i32_0 : i32, i32
  }
  func.func @transform_6(%arg0: i32) -> (i32, i32) {
    %c0_i32 = arith.constant 0 : i32
    %c0_i32_0 = arith.constant 0 : i32
    %c0_i32_1 = arith.constant 0 : i32
    return %c0_i32, %c0_i32_0 : i32, i32
  }
  func.func @transform_7(%arg0: i32) -> (i32, i32) {
    %c0_i32 = arith.constant 0 : i32
    %c0_i32_0 = arith.constant 0 : i32
    %c0_i32_1 = arith.constant 0 : i32
    return %c0_i32, %c0_i32_0 : i32, i32
  }
  func.func @transform_8(%arg0: i32) -> (i32, i32) {
    %c0_i32 = arith.constant 0 : i32
    %c0_i32_0 = arith.constant 0 : i32
    %c0_i32_1 = arith.constant 0 : i32
    return %c0_i32, %c0_i32_0 : i32, i32
  }
  func.func @transform_9(%arg0: i32) -> (i32, i32) {
    %c0_i32 = arith.constant 0 : i32
    %c0_i32_0 = arith.constant 0 : i32
    return %arg0, %c0_i32 : i32, i32
  }
}

</mosaic_0001>

<bundles_post_ra>
// kernel: tpu_custom_call.1
= control target key start
LH: loop header
LB: loop body
LE: loop exit
PB: predicated region body
PF: predicated region fallthrough
CT: control target
= control target key end

     0   :  { %14 = vsyncpa [#allocation3], 0  ;;  %s934_s0 = inlined_call_operand.vmem [shape: f32[8,32], index: 0, kind: input, shape index: {}]   ;;  %s935_s1 = inlined_call_operand.hbm [shape: f32[32,128], index: 1, kind: input, shape index: {}]   ;;  %s936_s2 = inlined_call_operand.vmem [shape: f32[1,128], index: 2, kind: input, shape index: {}]   ;;  %s937_s3 = inlined_call_operand.vmem [shape: f32[128,128], index: 3, kind: input, shape index: {}]   ;;  %s938_s4 = inlined_call_operand.vmem [shape: f32[1,128], index: 4, kind: input, shape index: {}]   ;;  %s939_s5 = inlined_call_operand.hbm [shape: f32[128,128], index: 5, kind: input, shape index: {}]   ;;  %s940_s6 = inlined_call_operand.vmem [shape: f32[1,128], index: 6, kind: input, shape index: {}]   ;;  %s941_s7 = inlined_call_operand.vmem [shape: f32[128,16], index: 7, kind: input, shape index: {}]   ;;  %s942_s8 = inlined_call_operand.vmem [shape: f32[1,16], index: 8, kind: input, shape index: {}]   ;;  %s943_s9 = inlined_call_operand.hbm [shape: f32[8,16], index: 9, kind: output, shape index: {}]  }
   0x1   :  { %15 = vsyncpa [#allocation6], 0 }
   0x2   :  { %16 = vsyncpa [#allocation4], 0  ;;  %s697_s30 = smov [#allocation2]  }
   0x3   :  { %s24_s10 = sshll.u32 %s697_s30, 4  ;;  %s25_s10 = int_to_ptr.vmem [resolvable:$true] %s24_s10 }
   0x4   :  { %s639_s11 = scalar_lea.vmem %s25_s10, 512  ;;  %p644_p1 = scmp.lt.s32.totalorder %s25_s10, %s25_s10 }
   0x5   :  { %p640_p0 = scmp.ne.s32.totalorder %s25_s10, %s639_s11  ;;  %p645_p2 = scmp.lt.s32.totalorder %s639_s11, %s639_s11 }
   0x7   :  { %p646_p3 = por %p645_p2, %p644_p1 }
   0x9   :  { %p647_p4 = pnand %p646_p3, %p640_p0 }
   0xb   :  { %650 = shalt.err (!%p647_p4)
}
   0xc   :  { %s698_s12 = smov 128   ;;  %s699_s13 = smov 8  }
   0xd   :  { %30 = dma.hbm_to_vmem [thread:$0]  %s935_s1, 512, %s25_s10, [#allocation3], %s698_s12, %s698_s12, %s699_s13  }
   0xe   :  { %s700_s16 = smov [#allocation5]  }
   0xf   :  { %s42_s17 = sshll.u32 %s700_s16, 4  ;;  %s43_s17 = int_to_ptr.vmem [resolvable:$true] %s42_s17 }
  0x10   :  { %s659_s18 = scalar_lea.vmem %s43_s17, 2048  ;;  %p664_p6 = scmp.lt.s32.totalorder %s43_s17, %s43_s17 }
  0x11   :  { %p660_p5 = scmp.ne.s32.totalorder %s43_s17, %s659_s18  ;;  %p665_p7 = scmp.lt.s32.totalorder %s659_s18, %s659_s18 }
  0x13   :  { %p666_p8 = por %p665_p7, %p664_p6 }
  0x15   :  { %p667_p9 = pnand %p666_p8, %p660_p5 }
  0x17   :  { %670 = shalt.err (!%p667_p9)
}
  0x18   :  { %48 = dma.hbm_to_vmem [thread:$0]  %s939_s5, 2048, %s43_s17, [#allocation6], %s698_s12, %s698_s12, %s699_s13  }
  0x19   :  { %691 = dma.done.wait [#allocation3], 512  }
  0x1a   :  { %692 = vsyncadd [#allocation3], 4294966784 }
  0x1b   :  { %693 = dma.done.wait [#allocation6], 2048  }
  0x1c   :  { %694 = vsyncadd [#allocation6], 4294965248  ;;  %v701_v0 = vmov 0.0   ;;  %vm702_vm0 = vmmov 0   ;;  %v65_v1 = vld [vmem:[#allocation2 + $0x18] sm:$0xff]  ;;  %v64_v2 = vld [vmem:[#allocation2 + $0x10] sm:$0xff] }
  0x1d   :  { %508 = vmatprep.subr.mxu0 %v701_v0  ;;  %516 = vmatprep.mubr.msk.f32.mxu0 %vm702_vm0, %v701_v0  ;;  %v163_v3 = vld [vmem:[%s937_s3 + $0x78] sm:$0xff]  ;;  %v63_v4 = vld [vmem:[#allocation2 + $0x8] sm:$0xff]  ;;  %v162_v5 = vld [vmem:[%s937_s3 + $0x70] sm:$0xff]  ;;  %vm73_vm1 = vcmask 261120   ;;  %s703_s18 = smov [#allocation7]   ;;  %vm429_vm2 = vcmask 130048  }
  0x1e   :  { %519 = vmatprep.subr.mxu1 %v701_v0  ;;  %551 = vmatprep.mubr.msk.f32.mxu1 %vm702_vm0, %v701_v0  ;;  %v161_v6 = vld [vmem:[%s937_s3 + $0x68] sm:$0xff]  ;;  %v62_v7 = vld [vmem:[#allocation2] sm:$0xff]  ;;  %v159_v10 = vld [vmem:[%s937_s3 + $0x58] sm:$0xff]  ;;  %s437_s19 = sshll.u32 %s703_s18, 4  ;;  %s438_s19 = int_to_ptr.vmem [resolvable:$true] %s437_s19 }
  0x1f   :  { %509 = vmatpush3.msra.mxu0 %v65_v1  ;;  %520 = vmatpush3.msra.mxu1 %v163_v3  ;;  %v61_v8 = vld [vmem:[%s934_s0] sm:$0xff]  ;;  %v158_v11 = vld [vmem:[%s937_s3 + $0x50] sm:$0xff]  ;;  %v157_v12 = vld [vmem:[%s937_s3 + $0x48] sm:$0xff]  ;;  %p676_p11 = scmp.lt.s32.totalorder %s438_s19, %s438_s19 }
  0x20   :  { %510 = vmatprep.subr.mxu0 %v701_v0  ;;  %521 = vmatprep.subr.mxu1 %v701_v0  ;;  %v160_v9 = vld [vmem:[%s937_s3 + $0x60] sm:$0xff]  ;;  %v155_v14 = vld [vmem:[%s937_s3 + $0x38] sm:$0xff]  ;;  %v154_v15 = vld [vmem:[%s937_s3 + $0x30] sm:$0xff] }
  0x21   :  { %511 = vmatpush3.msra.mxu0 %v64_v2  ;;  %522 = vmatpush3.msra.mxu1 %v162_v5  ;;  %v156_v13 = vld [vmem:[%s937_s3 + $0x40] sm:$0xff]  ;;  %v153_v16 = vld [vmem:[%s937_s3 + $0x28] sm:$0xff]  ;;  %v151_v18 = vld [vmem:[%s937_s3 + $0x18] sm:$0xff] }
  0x22   :  { %512 = vmatprep.subr.mxu0 %v701_v0  ;;  %523 = vmatprep.subr.mxu1 %v701_v0  ;;  %v152_v17 = vld [vmem:[%s937_s3 + $0x20] sm:$0xff]  ;;  %v150_v19 = vld [vmem:[%s937_s3 + $0x10] sm:$0xff]  ;;  %v149_v20 = vld [vmem:[%s937_s3 + $0x8] sm:$0xff] }
  0x23   :  { %513 = vmatpush3.msra.mxu0 %v63_v4  ;;  %524 = vmatpush3.msra.mxu1 %v161_v6  ;;  %v148_v21 = vld [vmem:[%s937_s3] sm:$0xff]  ;;  %v257_v22 = vld [vmem:[#allocation5 + $0x78] sm:$0xff]  ;;  %v256_v23 = vld [vmem:[#allocation5 + $0x70] sm:$0xff] }
  0x24   :  { %514 = vmatprep.subr.mxu0 %v701_v0  ;;  %525 = vmatprep.subr.mxu1 %v701_v0  ;;  %v255_v24 = vld [vmem:[#allocation5 + $0x68] sm:$0xff]  ;;  %v254_v25 = vld [vmem:[#allocation5 + $0x60] sm:$0xff]  ;;  %v253_v26 = vld [vmem:[#allocation5 + $0x58] sm:$0xff] }
  0x25   :  { %515 = vmatpush3.msra.mxu0 %v62_v7  ;;  %526 = vmatpush3.msra.mxu1 %v160_v9  ;;  %v252_v27 = vld [vmem:[#allocation5 + $0x50] sm:$0xff]  ;;  %v251_v28 = vld [vmem:[#allocation5 + $0x48] sm:$0xff]  ;;  %v250_v29 = vld [vmem:[#allocation5 + $0x40] sm:$0xff] }
  0x26   :  { %517 = vmatmul.mubr.msk.f32.vlgmr.msra.gmra.mxu0 %vm73_vm1, %v61_v8  ;;  %527 = vmatprep.subr.mxu1 %v701_v0  ;;  %v249_v30 = vld [vmem:[#allocation5 + $0x38] sm:$0xff]  ;;  %v248_v31 = vld [vmem:[#allocation5 + $0x30] sm:$0xff]  ;;  %v247_v32 = vld [vmem:[#allocation5 + $0x28] sm:$0xff] }
  0x27   :  { %554 = vmatprep.subr.mxu0 %v701_v0  ;;  %528 = vmatpush3.msra.mxu1 %v159_v10  ;;  %v246_v33 = vld [vmem:[#allocation5 + $0x20] sm:$0xff]  ;;  %v245_v34 = vld [vmem:[#allocation5 + $0x18] sm:$0xff]  ;;  %v244_v40 = vld [vmem:[#allocation5 + $0x10] sm:$0xff] }
  0x28   :  { %586 = vmatprep.mubr.msk.f32.mxu0 %vm702_vm0, %v701_v0  ;;  %529 = vmatprep.subr.mxu1 %v701_v0  ;;  %v447_v35 = vld [vmem:[%s936_s2] ss:$0 sm:$0xff]  ;;  %v243_v41 = vld [vmem:[#allocation5 + $0x8] sm:$0xff]  ;;  %v351_v43 = vld [vmem:[%s941_s7 + $0x78] sm:$0xff] }
  0x29   :  { %530 = vmatpush3.msra.mxu1 %v158_v11  ;;  %555 = vmatpush3.msra.mxu0 %v257_v22  ;;  %v242_v42 = vld [vmem:[#allocation5] sm:$0xff]  ;;  %v350_v44 = vld [vmem:[%s941_s7 + $0x70] sm:$0xff]  ;;  %v349_v45 = vld [vmem:[%s941_s7 + $0x68] sm:$0xff] }
  0x2a   :  { %531 = vmatprep.subr.mxu1 %v701_v0  ;;  %556 = vmatprep.subr.mxu0 %v701_v0  ;;  %v348_v46 = vld [vmem:[%s941_s7 + $0x60] sm:$0xff]  ;;  %v347_v47 = vld [vmem:[%s941_s7 + $0x58] sm:$0xff]  ;;  %v346_v48 = vld [vmem:[%s941_s7 + $0x50] sm:$0xff] }
  0x2b   :  { %532 = vmatpush3.msra.mxu1 %v157_v12  ;;  %557 = vmatpush3.msra.mxu0 %v256_v23  ;;  %v345_v49 = vld [vmem:[%s941_s7 + $0x48] sm:$0xff]  ;;  %v344_v50 = vld [vmem:[%s941_s7 + $0x40] sm:$0xff]  ;;  %v343_v51 = vld [vmem:[%s941_s7 + $0x38] sm:$0xff] }
  0x2c   :  { %533 = vmatprep.subr.mxu1 %v701_v0  ;;  %558 = vmatprep.subr.mxu0 %v701_v0  ;;  %v342_v52 = vld [vmem:[%s941_s7 + $0x30] sm:$0xff]  ;;  %v341_v53 = vld [vmem:[%s941_s7 + $0x28] sm:$0xff]  ;;  %v340_v54 = vld [vmem:[%s941_s7 + $0x20] sm:$0xff] }
  0x2d   :  { %534 = vmatpush3.msra.mxu1 %v156_v13  ;;  %559 = vmatpush3.msra.mxu0 %v255_v24  ;;  %v339_v55 = vld [vmem:[%s941_s7 + $0x18] sm:$0xff]  ;;  %v449_v56 = vld [vmem:[%s938_s4] ss:$0 sm:$0xff]  ;;  %v338_v61 = vld [vmem:[%s941_s7 + $0x10] sm:$0xff] }
  0x2e   :  { %535 = vmatprep.subr.mxu1 %v701_v0  ;;  %560 = vmatprep.subr.mxu0 %v701_v0  ;;  %v337_v62 = vld [vmem:[%s941_s7 + $0x8] sm:$0xff]  ;;  %v336_v63 = vld [vmem:[%s941_s7] sm:$0xff]  ;;  %s671_s7 = scalar_lea.vmem %s438_s19, 128 }
  0x2f   :  { %536 = vmatpush3.msra.mxu1 %v155_v14  ;;  %561 = vmatpush3.msra.mxu0 %v254_v25  ;;  %v450_v1 = vld [vmem:[%s940_s6] ss:$0 sm:$0xff]  ;;  %p672_p10 = scmp.ne.s32.totalorder %s438_s19, %s671_s7  ;;  %p677_p12 = scmp.lt.s32.totalorder %s671_s7, %s671_s7 }
  0x30   :  { %537 = vmatprep.subr.mxu1 %v701_v0  ;;  %562 = vmatprep.subr.mxu0 %v701_v0  ;;  %v451_v6 = vld [vmem:[%s942_s8] ss:$0 sm:$0xff] }
  0x31   :  { %538 = vmatpush3.msra.mxu1 %v154_v15  ;;  %563 = vmatpush3.msra.mxu0 %v253_v26  ;;  %p678_p13 = por %p677_p12, %p676_p11 }
  0x32   :  { %539 = vmatprep.subr.mxu1 %v701_v0  ;;  %564 = vmatprep.subr.mxu0 %v701_v0 }
  0x33   :  { %540 = vmatpush3.msra.mxu1 %v153_v16  ;;  %565 = vmatpush3.msra.mxu0 %v252_v27  ;;  %p679_p0 = pnand %p678_p13, %p672_p10 }
  0x34   :  { %541 = vmatprep.subr.mxu1 %v701_v0  ;;  %566 = vmatprep.subr.mxu0 %v701_v0 }
  0x35   :  { %542 = vmatpush3.msra.mxu1 %v152_v17  ;;  %567 = vmatpush3.msra.mxu0 %v251_v28 }
  0x36   :  { %543 = vmatprep.subr.mxu1 %v701_v0  ;;  %568 = vmatprep.subr.mxu0 %v701_v0 }
  0x37   :  { %544 = vmatpush3.msra.mxu1 %v151_v18  ;;  %569 = vmatpush3.msra.mxu0 %v250_v29 }
  0x38   :  { %545 = vmatprep.subr.mxu1 %v701_v0  ;;  %570 = vmatprep.subr.mxu0 %v701_v0 }
  0x39   :  { %546 = vmatpush3.msra.mxu1 %v150_v19  ;;  %571 = vmatpush3.msra.mxu0 %v249_v30 }
  0x3a   :  { %547 = vmatprep.subr.mxu1 %v701_v0  ;;  %572 = vmatprep.subr.mxu0 %v701_v0 }
  0x3b   :  { %548 = vmatpush3.msra.mxu1 %v149_v20  ;;  %573 = vmatpush3.msra.mxu0 %v248_v31 }
  0x3c   :  { %549 = vmatprep.subr.mxu1 %v701_v0  ;;  %574 = vmatprep.subr.mxu0 %v701_v0 }
  0x3d   :  { %550 = vmatpush3.msra.mxu1 %v148_v21  ;;  %575 = vmatpush3.msra.mxu0 %v247_v32 }
  0x3e   :  { %589 = vmatprep.subr.mxu1 %v701_v0  ;;  %576 = vmatprep.subr.mxu0 %v701_v0 }
  0x3f   :  { %577 = vmatpush3.msra.mxu0 %v246_v33 }
  0x40   :  { %578 = vmatprep.subr.mxu0 %v701_v0 }
  0x41   :  { %579 = vmatpush3.msra.mxu0 %v245_v34 }
  0x42   :  { %580 = vmatprep.subr.mxu0 %v701_v0 }
  0x43   :  { %581 = vmatpush3.msra.mxu0 %v244_v40 }
  0x44   :  { %582 = vmatprep.subr.mxu0 %v701_v0 }
  0x45   :  { %583 = vmatpush3.msra.mxu0 %v243_v41 }
  0x46   :  { %584 = vmatprep.subr.mxu0 %v701_v0 }
  0x47   :  { %585 = vmatpush3.msra.mxu0 %v242_v42 }
  0xe6   :  { %v143_v36 = vpop.f32.mrf.mxu0 }
  0xe7   :  { %v144_v37 = vadd.f32 %v447_v35, %v143_v36 }
  0xe8   :  { %v518_v38 = vpop.f32.mrf.mxu0 }
  0xe9   :  { %v147_v39 = vmax.f32 %v144_v37, 0.0 }
  0xeb   :  { %552 = vmatmul.mubr.f32.vlgmr.msra.gmra.mxu1 %v147_v39 }
  0xec   :  { %621 = vmatprep.mubr.msk.f32.mxu1 %vm702_vm0, %v701_v0  ;;  %590 = vmatpush3.msra.mxu1 %v351_v43 }
  0xed   :  { %591 = vmatprep.subr.mxu1 %v701_v0 }
  0xee   :  { %592 = vmatpush3.msra.mxu1 %v350_v44 }
  0xef   :  { %593 = vmatprep.subr.mxu1 %v701_v0 }
  0xf0   :  { %594 = vmatpush3.msra.mxu1 %v349_v45 }
  0xf1   :  { %595 = vmatprep.subr.mxu1 %v701_v0 }
  0xf2   :  { %596 = vmatpush3.msra.mxu1 %v348_v46 }
  0xf3   :  { %597 = vmatprep.subr.mxu1 %v701_v0 }
  0xf4   :  { %598 = vmatpush3.msra.mxu1 %v347_v47 }
  0xf5   :  { %599 = vmatprep.subr.mxu1 %v701_v0 }
  0xf6   :  { %600 = vmatpush3.msra.mxu1 %v346_v48 }
  0xf7   :  { %601 = vmatprep.subr.mxu1 %v701_v0 }
  0xf8   :  { %602 = vmatpush3.msra.mxu1 %v345_v49 }
  0xf9   :  { %603 = vmatprep.subr.mxu1 %v701_v0 }
  0xfa   :  { %604 = vmatpush3.msra.mxu1 %v344_v50 }
  0xfb   :  { %605 = vmatprep.subr.mxu1 %v701_v0 }
  0xfc   :  { %606 = vmatpush3.msra.mxu1 %v343_v51 }
  0xfd   :  { %607 = vmatprep.subr.mxu1 %v701_v0 }
  0xfe   :  { %608 = vmatpush3.msra.mxu1 %v342_v52 }
  0xff   :  { %609 = vmatprep.subr.mxu1 %v701_v0 }
 0x100   :  { %610 = vmatpush3.msra.mxu1 %v341_v53 }
 0x101   :  { %611 = vmatprep.subr.mxu1 %v701_v0 }
 0x102   :  { %612 = vmatpush3.msra.mxu1 %v340_v54 }
 0x103   :  { %613 = vmatprep.subr.mxu1 %v701_v0 }
 0x104   :  { %614 = vmatpush3.msra.mxu1 %v339_v55 }
 0x105   :  { %615 = vmatprep.subr.mxu1 %v701_v0 }
 0x106   :  { %616 = vmatpush3.msra.mxu1 %v338_v61 }
 0x107   :  { %617 = vmatprep.subr.mxu1 %v701_v0 }
 0x108   :  { %618 = vmatpush3.msra.mxu1 %v337_v62 }
 0x109   :  { %619 = vmatprep.subr.mxu1 %v701_v0 }
 0x10a   :  { %620 = vmatpush3.msra.mxu1 %v336_v63 }
 0x1ab   :  { %v237_v57 = vpop.f32.mrf.mxu1 }
 0x1ac   :  { %v238_v58 = vadd.f32 %v449_v56, %v237_v57 }
 0x1ad   :  { %v553_v59 = vpop.f32.mrf.mxu1 }
 0x1ae   :  { %v241_v60 = vmax.f32 %v238_v58, 0.0 }
 0x1b0   :  { %587 = vmatmul.mubr.f32.vlgmr.msra.gmra.mxu0 %v241_v60 }
 0x270   :  { %v331_v2 = vpop.f32.mrf.mxu0 }
 0x271   :  { %v332_v3 = vadd.f32 %v450_v1, %v331_v2 }
 0x272   :  { %v588_v4 = vpop.f32.mrf.mxu0 }
 0x273   :  { %v335_v5 = vmax.f32 %v332_v3, 0.0 }
 0x275   :  { %622 = vmatmul.mubr.f32.vlgmr.msra.gmra.mxu1 %v335_v5 }
 0x335   :  { %v425_v0 = vpop.f32.mrf.mxu1 }
 0x336   :  { %v426_v7 = vadd.f32 %v451_v6, %v425_v0 }
 0x337   :  { %v623_v8 = vpop.f32.mrf.mxu1 }
 0x338   :  { %430 = vst.msk [vmem:[#allocation7] sm:$0xff] %vm429_vm2, %v426_v7 }
 0x339   :  { %682 = shalt.err (!%p679_p0)
}
 0x33a   :  { %440 = dma.vmem_to_hbm [thread:$0]  %s438_s19, 128, %s943_s9, [#allocation4]  }
 0x33b   :  { %695 = dma.done.wait [#allocation4], 128  }
 0x33c   :  { %696 = vsyncadd [#allocation4], 4294967168 }
 0x33d   :  { %444 = vsyncpa [#allocation3], 1 }
 0x33e   :  { %445 = vsyncpa [#allocation6], 1 }
 0x33f   :  { %446 = vsyncpa [#allocation4], 1 }

</bundles_post_ra>
